<compile_context>
chip_gen: v5e
topology: v5e:2x2
jax: 0.10.0
libtpu: 0.0.40
codegen_flags: <defaults>
</compile_context>

<pallas_src>
import functools

import jax
import jax.numpy as jnp
import numpy as np
from jax.experimental import pallas as pl
from jax.experimental.pallas import tpu as pltpu

N_PRIME = 512


def _coverage_attention_kernel(x_ref, w_ref, nu_ref, ctx_ref, alpha_ref, *,
                               num_channels):
    """One lane-block (== one batch element) of fused coverage attention.

    x_ref     : (K, L)      f32   rows = [a (C) ; im2col patches (KK) ; 1 ; 0-pad]
    w_ref     : (1, Np, K)  bf16  fused weight [U_a | U_f@Wc | (u_pred+U_f@bc) | 0]
    nu_ref    : (1, Np)     bf16
    ctx_ref   : (1, 1, C)   f32   context row (lane-dense)
    alpha_ref : (1, 1, L)   f32   attention weights row (lane-dense)
    """
    x = x_ref[...]                                                # (K, L) f32
    w = w_ref[0]                                                  # (Np, K) bf16

    # Single fused MXU matmul replaces conv / U_a / U_f projections + bias adds.
    z_pre = jnp.dot(w, x.astype(jnp.bfloat16),
                    preferred_element_type=jnp.float32)           # (Np, L) f32
    z = jnp.tanh(z_pre)                                           # f32 (EUP)

    # e_t = nu_attn @ tanh(...)  -- bf16 operands, f32 accumulation.
    e_t = jnp.dot(nu_ref[...], z.astype(jnp.bfloat16),
                  preferred_element_type=jnp.float32)             # (1, L) f32

    # Softmax over the attention (lane) axis, in f32.
    m = jnp.max(e_t, axis=-1, keepdims=True)
    p = jnp.exp(e_t - m)
    denom = jnp.sum(p, axis=-1, keepdims=True)
    alpha_t = p * pl.reciprocal(denom, approx=True)               # (1, L)
    alpha_ref[0] = alpha_t

    # context[c] = sum_L alpha_t * a[c]  ->  lane-dense (1, C) row.
    a_mat = x[:num_channels, :]                                   # (C, L) f32
    ctx_ref[0] = jax.lax.dot_general(
        alpha_t, a_mat, (((1,), (1,)), ((), ())),
        preferred_element_type=jnp.float32)                       # (1, C)


def coverage_attention_forward(x, u_pred, alpha_state, params, kernel_size,
                               padding):
    """Forward pass of CoverageAttention.

    x           : (B, C, H, W)   NCHW input (like the PyTorch module)
    u_pred      : (B, n_prime)
    alpha_state : (B, T, H*W)    accumulated coverage (zeros on the first call)
    returns     : (ctx (B, C), alpha_t (B, 1, H*W))
                  alpha_t lets the caller update the coverage state:
                  new_state = concatenate([alpha_state, alpha_t], axis=1)
    """
    B, C, H, W = x.shape
    L = H * W
    kh = kw = kernel_size
    KK = kh * kw
    O = params["U_f"].shape[1]
    Np = params["U_a"].shape[0]

    a = x.reshape(B, C, L).astype(jnp.float32)

    # ---- glue: coverage-map sum -> pad -> im2col patches (cheap at this size).
    # TODO(synk): for large H*W build the patches inside the kernel from the
    # padded coverage map (pl.ds / pltpu.roll) instead of a (B, KK, L) HBM copy.
    alpha_sum = alpha_state.sum(axis=1).reshape(B, H, W).astype(jnp.float32)
    ap = jnp.pad(alpha_sum, ((0, 0), (padding, padding), (padding, padding)))
    cols = [ap[:, ki:ki + H, kj:kj + W].reshape(B, L)
            for ki in range(kh) for kj in range(kw)]
    patches = jnp.stack(cols, axis=1)                              # (B, KK, L)

    # ---- fused input [a ; patches ; ones ; zero-pad], batch folded into lanes.
    Kf = C + KK + 1
    Kp = ((Kf + 15) // 16) * 16            # pad contraction dim for bf16 packing
    xin = jnp.concatenate(
        [a, patches, jnp.ones((B, 1, L), jnp.float32),
         jnp.zeros((B, Kp - Kf, L), jnp.float32)], axis=1)         # (B, Kp, L)
    xin_flat = jnp.transpose(xin, (1, 0, 2)).reshape(Kp, B * L)    # (Kp, B*L)

    # ---- fused weight: fold conv weight/bias, U_f, U_a and u_pred together.
    U_a = params["U_a"].astype(jnp.float32)                        # (Np, C)
    U_f = params["U_f"].astype(jnp.float32)                        # (Np, O)
    conv_w = params["conv_w"].reshape(O, KK).astype(jnp.float32)   # (O, KK)
    conv_b = params["conv_b"].astype(jnp.float32)                  # (O,)
    W_f = U_f @ conv_w                                             # (Np, KK)
    bias = u_pred.astype(jnp.float32) + (U_f @ conv_b)[None, :]    # (B, Np)
    w_shared = jnp.concatenate([U_a, W_f], axis=1)                 # (Np, C+KK)
    w_all = jnp.concatenate(
        [jnp.broadcast_to(w_shared[None], (B, Np, C + KK)),
         bias[:, :, None],
         jnp.zeros((B, Np, Kp - Kf), jnp.float32)],
        axis=2).astype(jnp.bfloat16)                               # (B, Np, Kp)

    nu_row = params["nu"].reshape(1, Np).astype(jnp.bfloat16)      # (1, Np)

    # TODO(synk): for large L add an L-tiling grid axis ("arbitrary") with an
    # online-softmax accumulator so the (Np, L) intermediate fits v7x VMEM.
    kernel = functools.partial(_coverage_attention_kernel, num_channels=C)
    ctx, alpha_t = pl.pallas_call(
        kernel,
        out_shape=(jax.ShapeDtypeStruct((B, 1, C), jnp.float32),
                   jax.ShapeDtypeStruct((B, 1, L), jnp.float32)),
        grid=(B,),
        in_specs=[
            pl.BlockSpec((Kp, L), lambda b: (0, b)),         # fused inputs (lane block)
            pl.BlockSpec((1, Np, Kp), lambda b: (b, 0, 0)),  # fused weight (per-batch bias)
            pl.BlockSpec((1, Np), lambda b: (0, 0)),         # nu row (shared)
        ],
        out_specs=(pl.BlockSpec((1, 1, C), lambda b: (b, 0, 0)),
                   pl.BlockSpec((1, 1, L), lambda b: (b, 0, 0))),
        compiler_params=pltpu.CompilerParams(
            dimension_semantics=("parallel",)),
    )(xin_flat, w_all, nu_row)

    return ctx.reshape(B, C), alpha_t


def _xavier_normal(key, shape):
    fan_out, fan_in = shape
    std = (2.0 / (fan_in + fan_out)) ** 0.5
    return std * jax.random.normal(key, shape, dtype=jnp.float32)


if __name__ == "__main__":
    # Small shapes consistent with the module: attn_size = H*W.
    B, C, H, W = 2, 4, 16, 16
    L = H * W
    O = 4                       # output_size (coverage channels)
    ksz, pad = 3, 1             # kernel_size / padding (preserves H, W)

    key = jax.random.PRNGKey(0)
    k_ua, k_uf, k_nu, k_cw, k_cb, k_x, k_up, k_al = jax.random.split(key, 8)

    params = {
        "U_a": _xavier_normal(k_ua, (N_PRIME, C)),
        "U_f": _xavier_normal(k_uf, (N_PRIME, O)),
        "nu": _xavier_normal(k_nu, (1, N_PRIME))[0],
        "conv_w": 0.1 * jax.random.normal(k_cw, (O, 1, ksz, ksz), dtype=jnp.float32),
        "conv_b": 0.1 * jax.random.normal(k_cb, (O,), dtype=jnp.float32),
    }

    x = jax.random.normal(k_x, (B, C, H, W), dtype=jnp.float32)
    u_pred = jax.random.normal(k_up, (B, N_PRIME), dtype=jnp.float32)
    # Coverage state: zeros on the module's first call (reset_alpha); use a
    # nonzero accumulated state here so the conv path is exercised.
    alpha_state = jax.nn.softmax(
        jax.random.normal(k_al, (B, 3, L), dtype=jnp.float32), axis=-1)

    ctx, alpha_t = coverage_attention_forward(x, u_pred, alpha_state, params,
                                              ksz, pad)
    ctx, alpha_t = jax.block_until_ready((ctx, alpha_t))

    # Coverage-state update, mirroring torch.cat((self.alpha, alpha_t.unsqueeze(1)), 1).
    new_alpha_state = jnp.concatenate([alpha_state, alpha_t], axis=1)

    # ---- plain-JAX reference (mirrors the PyTorch forward) ----
    a_mat = x.reshape(B, C, L)
    alpha_sum_ref = alpha_state.sum(axis=1).reshape(B, H, W)
    conv_out = jax.lax.conv_general_dilated(
        alpha_sum_ref[:, None], params["conv_w"], (1, 1),
        [(pad, pad), (pad, pad)],
        dimension_numbers=("NCHW", "OIHW", "NCHW"),
    ) + params["conv_b"][None, :, None, None]
    conv_out = conv_out.reshape(B, O, L)
    u_a = jnp.einsum("nc,bcl->bnl", params["U_a"], a_mat)
    u_f = jnp.einsum("no,bol->bnl", params["U_f"], conv_out)
    z = jnp.tanh(u_pred[:, :, None] + u_a + u_f)
    e_t = jnp.einsum("n,bnl->bl", params["nu"], z)
    alpha_expected = jax.nn.softmax(e_t, axis=1)
    ctx_expected = jnp.sum(alpha_expected[:, None, :] * a_mat, axis=2)

    assert ctx.shape == (B, C)
    assert alpha_t.shape == (B, 1, L)
    assert new_alpha_state.shape == (B, 4, L)
    np.testing.assert_allclose(np.asarray(ctx), np.asarray(ctx_expected),
                               rtol=3e-2, atol=3e-2)
    np.testing.assert_allclose(np.asarray(alpha_t[:, 0, :]),
                               np.asarray(alpha_expected),
                               rtol=5e-2, atol=2e-3)
    print("KERNEL_OK")
</pallas_src>

<mosaic_0001>
module attributes {stable_mosaic.version = 11 : i64} {
  func.func @_coverage_attention_kernel(%arg0: i32, %arg1: memref<16x256xf32, #tpu.memory_space<vmem>>, %arg2: memref<1x512x16xbf16, #tpu.memory_space<vmem>>, %arg3: memref<1x512xbf16, #tpu.memory_space<vmem>>, %arg4: memref<1x1x4xf32, #tpu.memory_space<vmem>>, %arg5: memref<1x1x256xf32, #tpu.memory_space<vmem>>) attributes {dimension_semantics = [#tpu.dimension_semantics<parallel>], iteration_bounds = array<i64: 2>, scalar_prefetch = 0 : i64, scratch_operands = 0 : i64, tpu.core_type = #tpu.core_type<tc>, window_params = [{transform_indices = @transform_0, window_bounds = array<i64: 16, 256>}, {transform_indices = @transform_1, window_bounds = array<i64: 1, 512, 16>}, {pipeline_mode = #tpu.pipeline_mode<synchronous>, transform_indices = @transform_2, window_bounds = array<i64: 1, 512>}, {transform_indices = @transform_3, window_bounds = array<i64: 1, 1, 4>}, {transform_indices = @transform_4, window_bounds = array<i64: 1, 1, 256>}]} {
    %c0 = arith.constant 0 : index
    %c0_0 = arith.constant 0 : index
    %0 = vector.load %arg1[%c0, %c0_0] : memref<16x256xf32, #tpu.memory_space<vmem>>, vector<16x256xf32>
    %c0_1 = arith.constant 0 : index
    %c0_2 = arith.constant 0 : index
    %c0_3 = arith.constant 0 : index
    %1 = vector.load %arg2[%c0_1, %c0_2, %c0_3] : memref<1x512x16xbf16, #tpu.memory_space<vmem>>, vector<1x512x16xbf16>
    %2 = vector.shape_cast %1 : vector<1x512x16xbf16> to vector<512x16xbf16>
    %3 = arith.truncf %0 : vector<16x256xf32> to vector<16x256xbf16>
    %cst = arith.constant dense<0.000000e+00> : vector<512x256xf32>
    %4 = tpu.matmul %2, %3, %cst {dimension_numbers = #tpu.dot_dimension_numbers<[1], [0], [0], [1], [0, 0, 1, 1], [], []>} : vector<512x16xbf16>, vector<16x256xbf16>, vector<512x256xf32> -> vector<512x256xf32>
    %5 = math.tanh %4 : vector<512x256xf32>
    %c0_4 = arith.constant 0 : index
    %c0_5 = arith.constant 0 : index
    %6 = vector.load %arg3[%c0_4, %c0_5] : memref<1x512xbf16, #tpu.memory_space<vmem>>, vector<1x512xbf16>
    %7 = arith.truncf %5 : vector<512x256xf32> to vector<512x256xbf16>
    %cst_6 = arith.constant dense<0.000000e+00> : vector<1x256xf32>
    %8 = tpu.matmul %6, %7, %cst_6 {dimension_numbers = #tpu.dot_dimension_numbers<[1], [0], [0], [1], [0, 0, 1, 1], [], []>} : vector<1x512xbf16>, vector<512x256xbf16>, vector<1x256xf32> -> vector<1x256xf32>
    %cst_7 = arith.constant dense<0xFF800000> : vector<1xf32>
    %9 = vector.multi_reduction <maximumf>, %8, %cst_7 [1] : vector<1x256xf32> to vector<1xf32>
    %10 = vector.shape_cast %9 : vector<1xf32> to vector<1x1xf32>
    %11 = vector.broadcast %10 : vector<1x1xf32> to vector<1x256xf32>
    %12 = arith.subf %8, %11 : vector<1x256xf32>
    %13 = math.exp %12 : vector<1x256xf32>
    %cst_8 = arith.constant dense<0.000000e+00> : vector<1xf32>
    %14 = vector.multi_reduction <add>, %13, %cst_8 [1] : vector<1x256xf32> to vector<1xf32>
    %15 = vector.shape_cast %14 : vector<1xf32> to vector<1x1xf32>
    %16 = tpu.reciprocal %15 {approx = true} : vector<1x1xf32> -> vector<1x1xf32>
    %17 = vector.broadcast %16 : vector<1x1xf32> to vector<1x256xf32>
    %18 = arith.mulf %13, %17 : vector<1x256xf32>
    %c0_9 = arith.constant 0 : index
    %c0_10 = arith.constant 0 : index
    %c0_11 = arith.constant 0 : index
    %19 = vector.load %arg5[%c0_9, %c0_10, %c0_11] : memref<1x1x256xf32, #tpu.memory_space<vmem>>, vector<1x1x256xf32>
    %20 = vector.shape_cast %19 : vector<1x1x256xf32> to vector<1x256xf32>
    %21 = vector.shape_cast %18 : vector<1x256xf32> to vector<1x1x256xf32>
    tpu.vector_store %arg5[%c0_9, %c0_10, %c0_11], %21 {strides = array<i32>} : memref<1x1x256xf32, #tpu.memory_space<vmem>>, vector<1x1x256xf32>,
    %22 = vector.extract_strided_slice %0 {offsets = [0, 0], sizes = [4, 256], strides = [1, 1]} : vector<16x256xf32> to vector<4x256xf32>
    %cst_12 = arith.constant dense<0.000000e+00> : vector<1x4xf32>
    %23 = tpu.matmul %18, %22, %cst_12 {dimension_numbers = #tpu.dot_dimension_numbers<[1], [1], [0], [0], [0, 0, 1, 0], [], []>} : vector<1x256xf32>, vector<4x256xf32>, vector<1x4xf32> -> vector<1x4xf32>
    %c0_13 = arith.constant 0 : index
    %c0_14 = arith.constant 0 : index
    %c0_15 = arith.constant 0 : index
    %24 = vector.load %arg4[%c0_13, %c0_14, %c0_15] : memref<1x1x4xf32, #tpu.memory_space<vmem>>, vector<1x1x4xf32>
    %25 = vector.shape_cast %24 : vector<1x1x4xf32> to vector<1x4xf32>
    %26 = vector.shape_cast %23 : vector<1x4xf32> to vector<1x1x4xf32>
    tpu.vector_store %arg4[%c0_13, %c0_14, %c0_15], %26 {strides = array<i32>} : memref<1x1x4xf32, #tpu.memory_space<vmem>>, vector<1x1x4xf32>,
    return
  }
  func.func @transform_0(%arg0: i32) -> (i32, i32) {
    %c0_i32 = arith.constant 0 : i32
    %c0_i32_0 = arith.constant 0 : i32
    return %c0_i32, %arg0 : i32, i32
  }
  func.func @transform_1(%arg0: i32) -> (i32, i32, i32) {
    %c0_i32 = arith.constant 0 : i32
    %c0_i32_0 = arith.constant 0 : i32
    %c0_i32_1 = arith.constant 0 : i32
    return %arg0, %c0_i32, %c0_i32_0 : i32, i32, i32
  }
  func.func @transform_2(%arg0: i32) -> (i32, i32) {
    %c0_i32 = arith.constant 0 : i32
    %c0_i32_0 = arith.constant 0 : i32
    %c0_i32_1 = arith.constant 0 : i32
    return %c0_i32, %c0_i32_0 : i32, i32
  }
  func.func @transform_3(%arg0: i32) -> (i32, i32, i32) {
    %c0_i32 = arith.constant 0 : i32
    %c0_i32_0 = arith.constant 0 : i32
    %c0_i32_1 = arith.constant 0 : i32
    return %arg0, %c0_i32, %c0_i32_0 : i32, i32, i32
  }
  func.func @transform_4(%arg0: i32) -> (i32, i32, i32) {
    %c0_i32 = arith.constant 0 : i32
    %c0_i32_0 = arith.constant 0 : i32
    %c0_i32_1 = arith.constant 0 : i32
    return %arg0, %c0_i32, %c0_i32_0 : i32, i32, i32
  }
}

</mosaic_0001>

<bundles_post_ra>
// kernel: tpu_custom_call.1
= control target key start
LH: loop header
LB: loop body
LE: loop exit
PB: predicated region body
PF: predicated region fallthrough
CT: control target
= control target key end

     0   :  { %10 = vsyncpa [#allocation4], 0  ;;  %s2752_s0 = inlined_call_operand.vmem [shape: f32[16,512], index: 0, kind: input, shape index: {}]   ;;  %s2753_s1 = inlined_call_operand.vmem [shape: bf16[2,512,16], index: 1, kind: input, shape index: {}]   ;;  %s2754_s2 = inlined_call_operand.vmem [shape: bf16[1,512], index: 2, kind: input, shape index: {}]   ;;  %s2755_s3 = inlined_call_operand.hbm [shape: f32[2,1,4], index: 3, kind: output, shape index: {0}]   ;;  %s2756_s4 = inlined_call_operand.hbm [shape: f32[2,1,256], index: 4, kind: output, shape index: {1}]  }
   0x1   :  { %12 = vsyncpa [#allocation4 + $0x1], 0 }
   0x2   :  { %13 = vsyncpa [#allocation6], 0 }
   0x3   :  { %15 = vsyncpa [#allocation6 + $0x1], 0  ;;  %s2108_s15 = smov 0   ;;  %s2110_s16 = smov 0  }
   0x4   :  { %s2112_s17 = smov 0   ;;  %s2114_s18 = smov 0  }
   0x5 LB: > { %s2129_s19 = sadd.s32 4294967295, %s2081_s18   ;;  %s1436_s20 = sadd.s32 4294967294, %s2081_s18   ;;  %s2081_s18 = sphi %s2114_s18, %s2825_s18   ;;  %s2077_s17 = sphi %s2112_s17, %s2824_s17   ;;  %s2073_s16 = sphi %s2110_s16, %s2823_s16   ;;  %s2069_s15 = sphi %s2108_s15, %s2822_s15  }
   0x6   : > { %s2133_s21 = sadd.s32 1, %s2081_s18   ;;  %s28_s22 = sadd.s32 1, %s2077_s17 }
   0x7   : > { %s25_s23 = ssub.s32 %s2081_s18, %s2133_s21  ;;  %p35_p0 = scmp.ne.s32.totalorder %s2077_s17, %s2073_s16 }
   0x8   : > { %p26_p1 = scmp.eq.s32.totalorder %s25_s23, 0  ;;  %p36_p2 = scmp.eq.s32.totalorder %s2081_s18, 0 }
   0x9   : > { %p112_p3 = scmp.eq.s32.totalorder %s2129_s19, 1  ;;  %p117_p4 = scmp.ne.s32.totalorder %s2073_s16, %s2069_s15 }
   0xa   : > { %s2145_s24 = scalar_select %p26_p1, %s2077_s17, %s28_s22  }
   0xb   : > { %p37_p5 = por %p36_p2, %p35_p0  ;;  %p2147_p6 = por %p112_p3, %p35_p0 }
   0xc   : > { %p118_p7 = scmp.eq.s32.totalorder %s1436_s20, 1  ;;  %p1438_p9 = scmp.ge.s32.totalorder %s2081_s18, 2 }
   0xe   : > { %p2151_p8 = por %p118_p7, %p117_p4  ;;  %163 = sbr.rel (%p1438_p9) target bundleno = 27 (0x1b), region = 20 }
  0x13   : > { %166 = sbr.rel (!%p37_p5) target bundleno = 27 (0x1b), region = 24  ;;  %s168_s27 = sand.u32 (%p37_p5), 1, %s2077_s17  }
  0x14   : > { %s1643_s28 = sshll.u32 (%p37_p5), %s2081_s18, 4  ;;  %s1439_s29 = sshll.u32 (%p37_p5), %s168_s27, 5 }
  0x15   : > { %s173_s6 = scalar_lea.vmem (%p37_p5), %s2752_s0, %s1643_s28  ;;  %s170_s7 = scalar_lea.vmem (%p37_p5), [#allocation2], %s1439_s29 }
  0x16   : > { %v186_v0 = vld [vmem:[%s173_s6] sm:$0xff] (%p37_p5)  ;;  %v188_v1 = vld [vmem:[%s173_s6 + $0x8] sm:$0xff] (%p37_p5) }
  0x17   : > { %v190_v2 = vld [vmem:[%s173_s6 + $0x20] sm:$0xff] (%p37_p5)  ;;  %187 = vst [vmem:[%s170_s7] sm:$0xff] (%p37_p5), %v186_v0  ;;  %v192_v3 = vld [vmem:[%s173_s6 + $0x28] sm:$0xff] (%p37_p5) }
  0x18   : > { %189 = vst [vmem:[%s170_s7 + $0x8] sm:$0xff] %v188_v1 }
  0x19   : > { %191 = vst [vmem:[%s170_s7 + $0x10] sm:$0xff] %v190_v2 }
  0x1a   : > { %193 = vst [vmem:[%s170_s7 + $0x18] sm:$0xff] %v192_v3 }
  0x1b PF: > { %p1442_p10 = scmp.ge.s32.totalorder %s2081_s18, 1  ;;  %p206_p11 = scmp.lt.s32.totalorder %s2081_s18, 3 }
  0x1d   : > { %p207_p12 = pnand %p1442_p10, %p206_p11 }
  0x1f   : > { %210 = sbr.rel (%p207_p12) target bundleno = 1123 (0x463), region = 51 }
  0x24   : > { %s2166_s8 = sand.u32 1, %s2073_s16   ;;  %p248_p13 = scmp.lt.s32.totalorder %s2129_s19, 1  ;;  %vm484_vm0 = vcmask 130048   ;;  %vm1226_vm1 = vcmask 1040384  }
  0x25   : > { %s1443_s9 = sshll.u32 %s2166_s8, 5  ;;  %s1444_s27 = sshll.u32 %s2166_s8, 1 }
  0x26   : > { %s2170_s10 = scalar_lea.vmem [#allocation2], %s1443_s9  ;;  %s246_s28 = scalar_lea.vmem [#allocation5], %s1444_s27 }
  0x27   : > { %v254_v4 = vld [vmem:[%s2170_s10] sm:$0xff]  ;;  %v256_v5 = vld [vmem:[%s2170_s10 + $0x10] sm:$0xff]  ;;  %s249_s11 = scalar_select %p248_p13, %s2129_s19, 1  ;;  %v255_v9 = vld [vmem:[%s2170_s10 + $0x8] sm:$0xff] }
  0x28   : > { %v322_v6 = vpack.c.bf16 %v256_v5, %v254_v4  ;;  %v257_v10 = vld [vmem:[%s2170_s10 + $0x18] sm:$0xff]  ;;  %s1640_s29 = sshll.u32 %s2129_s19, 1  ;;  %s1328_s7 = sshll.u32 %s246_s28, 4  ;;  %s1329_s7 = int_to_ptr.vmem [resolvable:$true] %s1328_s7 }
  0x29   : > { %s1644_s12 = sshll.u32 %s249_s11, 8  ;;  %v323_v11 = vpack.c.bf16 %v257_v10, %v255_v9  ;;  %s1326_s6 = scalar_lea.hbm %s2756_s4, %s1640_s29 }
  0x2a   : > { %588 = vmatpush.bf16.msra.mxu0 %v322_v6  ;;  %s2178_s20 = scalar_lea.vmem %s2753_s1, %s1644_s12  ;;  %1677 = vmatpush.bf16.msra.mxu2 %v322_v6  ;;  %s1330_s9 = sshll.u32 %s1326_s6, 4  ;;  %s1331_s9 = int_to_ptr.hbm [resolvable:$true] %s1330_s9 }
  0x2b   : > { %v1645_v7 = vld [vmem:[%s2178_s20] sm:$0xff]  ;;  %v1646_v8 = vld [vmem:[%s2178_s20 + $0x8] sm:$0xff]  ;;  %757 = vmatpush.bf16.msra.mxu1 %v323_v11  ;;  %1678 = vmatpush.bf16.msra.mxu3 %v323_v11  ;;  %v1647_v12 = vld [vmem:[%s2178_s20 + $0x10] sm:$0xff]  ;;  %s2001_s11 = sshra.s32 %s1331_s9, 4  ;;  %s2002_s11 = int_to_ptr.hbm [resolvable:$true] %s2001_s11 }
  0x2c   : > { %v1648_v13 = vld [vmem:[%s2178_s20 + $0x18] sm:$0xff]  ;;  %v1649_v14 = vld [vmem:[%s2178_s20 + $0x20] sm:$0xff]  ;;  %v1666_v15 = vld [vmem:[%s2178_s20 + $0xa8] sm:$0xff]  ;;  %s2003_s12 = scalar_lea.hbm %s2002_s11, 2  ;;  %p2008_p3 = scmp.lt.s32.totalorder %s2002_s11, %s2756_s4 }
  0x2d   : > { %1575 = vmatmul.msk.bf16.vlgmr.msra.gmra.mxu0 %vm484_vm0, %v1645_v7  ;;  %1596 = vmatmul.msk.bf16.vlgmr.msra.gmra.mxu2 %vm484_vm0, %v1666_v15  ;;  %v1650_v16 = vld [vmem:[%s2178_s20 + $0x28] sm:$0xff]  ;;  %v1667_v17 = vld [vmem:[%s2178_s20 + $0xb0] sm:$0xff]  ;;  %v1668_v19 = vld [vmem:[%s2178_s20 + $0xb8] sm:$0xff]  ;;  %p2004_p0 = scmp.ne.s32.totalorder %s2002_s11, %s2003_s12 }
  0x2e   : > { %1607 = vmatmul.msk.bf16.vlgmr.msra.gmra.mxu1 %vm484_vm0, %v1645_v7  ;;  %v1651_v18 = vld [vmem:[%s2178_s20 + $0x30] sm:$0xff]  ;;  %v1652_v20 = vld [vmem:[%s2178_s20 + $0x38] sm:$0xff]  ;;  %v2210_v21 = vld [vmem:[%s2178_s20 + $0xa0] sm:$0xff] }
  0x2f   : > { %1627 = vmatmul.msk.bf16.vlgmr.msra.gmra.mxu3 %vm484_vm0, %v2210_v21  ;;  %v1669_v22 = vld [vmem:[%s2178_s20 + $0xc0] sm:$0xff]  ;;  %v2222_v26 = vld [vmem:[%s2178_s20 + $0xc8] sm:$0xff]  ;;  %v2237_v33 = vld [vmem:[%s2178_s20 + $0xd0] sm:$0xff]  ;;  %p2005_p1 = pnand %p2004_p0, %p2147_p6 }
  0x30   : > { %v1653_v23 = vld [vmem:[%s2178_s20 + $0x40] sm:$0xff]  ;;  %v1654_v29 = vld [vmem:[%s2178_s20 + $0x48] sm:$0xff]  ;;  %v1655_v37 = vld [vmem:[%s2178_s20 + $0x50] sm:$0xff] }
  0x31   : > { %v2252_v42 = vld [vmem:[%s2178_s20 + $0xd8] sm:$0xff]  ;;  %v2273_v54 = vld [vmem:[%s2178_s20 + $0xe0] sm:$0xff]  ;;  %v2299_v2 = vld [vmem:[%s2178_s20 + $0xe8] sm:$0xff]  ;;  %p2006_p2 = pneg %p2005_p1 }
  0x32   : > { %v1656_v46 = vld [vmem:[%s2178_s20 + $0x58] sm:$0xff]  ;;  %v1657_v58 = vld [vmem:[%s2178_s20 + $0x60] sm:$0xff]  ;;  %v1658_v5 = vld [vmem:[%s2178_s20 + $0x68] sm:$0xff] }
  0x3d   : > { %1576 = vmatmul.msk.bf16.gmra.mxu0 %vm484_vm0, %v1646_v8  ;;  %1597 = vmatmul.msk.bf16.gmra.mxu2 %vm484_vm0, %v1667_v17 }
  0x3e   : > { %1608 = vmatmul.msk.bf16.gmra.mxu1 %vm484_vm0, %v1646_v8 }
  0x3f   : > { %1628 = vmatmul.msk.bf16.gmra.mxu3 %vm484_vm0, %v1666_v15 }
  0x4d   : > { %1577 = vmatmul.msk.bf16.gmra.mxu0 %vm484_vm0, %v1647_v12  ;;  %1598 = vmatmul.msk.bf16.gmra.mxu2 %vm484_vm0, %v1668_v19 }
  0x4e   : > { %1609 = vmatmul.msk.bf16.gmra.mxu1 %vm484_vm0, %v1647_v12 }
  0x4f   : > { %1629 = vmatmul.msk.bf16.gmra.mxu3 %vm484_vm0, %v1667_v17 }
  0x5d   : > { %1578 = vmatmul.msk.bf16.gmra.mxu0 %vm484_vm0, %v1648_v13  ;;  %1599 = vmatmul.msk.bf16.gmra.mxu2 %vm484_vm0, %v1669_v22 }
  0x5e   : > { %1610 = vmatmul.msk.bf16.gmra.mxu1 %vm484_vm0, %v1648_v13  ;;  %v2319_v13 = vld [vmem:[%s2178_s20 + $0xf0] sm:$0xff] }
  0x5f   : > { %1630 = vmatmul.msk.bf16.gmra.mxu3 %vm484_vm0, %v1668_v19 }
  0x6d   : > { %1579 = vmatmul.msk.bf16.gmra.mxu0 %vm484_vm0, %v1649_v14  ;;  %1600 = vmatmul.msk.bf16.gmra.mxu2 %vm484_vm0, %v2222_v26 }
  0x6e   : > { %1611 = vmatmul.msk.bf16.gmra.mxu1 %vm484_vm0, %v1649_v14 }
  0x6f   : > { %1631 = vmatmul.msk.bf16.gmra.mxu3 %vm484_vm0, %v1669_v22 }
  0x7d   : > { %1580 = vmatmul.msk.bf16.gmra.mxu0 %vm484_vm0, %v1650_v16  ;;  %1601 = vmatmul.msk.bf16.gmra.mxu2 %vm484_vm0, %v2237_v33 }
  0x7e   : > { %1612 = vmatmul.msk.bf16.gmra.mxu1 %vm484_vm0, %v1650_v16  ;;  %v1659_v16 = vld [vmem:[%s2178_s20 + $0x70] sm:$0xff] }
  0x7f   : > { %1632 = vmatmul.msk.bf16.gmra.mxu3 %vm484_vm0, %v2222_v26 }
  0x8d   : > { %1581 = vmatmul.msk.bf16.gmra.mxu0 %vm484_vm0, %v1651_v18  ;;  %1602 = vmatmul.msk.bf16.gmra.mxu2 %vm484_vm0, %v2252_v42 }
  0x8e   : > { %1613 = vmatmul.msk.bf16.gmra.mxu1 %vm484_vm0, %v1651_v18 }
  0x8f   : > { %1633 = vmatmul.msk.bf16.gmra.mxu3 %vm484_vm0, %v2237_v33 }
  0x9d   : > { %1582 = vmatmul.msk.bf16.gmra.mxu0 %vm484_vm0, %v1652_v20  ;;  %1603 = vmatmul.msk.bf16.gmra.mxu2 %vm484_vm0, %v2273_v54 }
  0x9e   : > { %1614 = vmatmul.msk.bf16.gmra.mxu1 %vm484_vm0, %v1652_v20 }
  0x9f   : > { %1634 = vmatmul.msk.bf16.gmra.mxu3 %vm484_vm0, %v2252_v42 }
  0xaa   : > { %v590_v24 = vpop.f32.mrf.mxu0 }
  0xab   : > { %1723 = vtanh.f32 %v590_v24  ;;  %v759_v34 = vpop.f32.mrf.mxu1 }
  0xad   : > { %1583 = vmatmul.msk.bf16.gmra.mxu0 %vm484_vm0, %v1653_v23  ;;  %1604 = vmatmul.msk.bf16.gmra.mxu2 %vm484_vm0, %v2299_v2 }
  0xae   : > { %1615 = vmatmul.msk.bf16.gmra.mxu1 %vm484_vm0, %v1653_v23 }
  0xaf   : > { %1635 = vmatmul.msk.bf16.gmra.mxu3 %vm484_vm0, %v2273_v54 }
  0xb0   : > { %v2301_v4 = vpop.f32.mrf.mxu2 }
  0xb1   : > { %v2227_v27 = vpop.eup %1723 }
  0xb2   : > { %v592_v25 = vpop.f32.mrf.mxu0 }
  0xb3   : > { %1725 = vtanh.f32 %v592_v25  ;;  %v761_v40 = vpop.f32.mrf.mxu1  ;;  %v2339_v25 = vld [vmem:[%s2178_s20 + $0xf8] sm:$0xff] }
  0xb8   : > { %v2312_v10 = vpop.f32.mrf.mxu2 }
  0xb9   : > { %v2229_v28 = vpop.eup %1725 }
  0xba   : > { %v595_v30 = vpop.f32.mrf.mxu0  ;;  %v1048_v31 = vpack.c.bf16 %v2229_v28, %v2227_v27 }
  0xbb   : > { %1727 = vtanh.f32 %v595_v30  ;;  %v764_v43 = vpop.f32.mrf.mxu1  ;;  %v1660_v30 = vld [vmem:[%s2178_s20 + $0x78] sm:$0xff] }
  0xbd   : > { %1584 = vmatmul.msk.bf16.gmra.mxu0 %vm484_vm0, %v1654_v29  ;;  %1605 = vmatmul.msk.bf16.gmra.mxu2 %vm484_vm0, %v2319_v13 }
  0xbe   : > { %1616 = vmatmul.msk.bf16.gmra.mxu1 %vm484_vm0, %v1654_v29 }
  0xbf   : > { %1636 = vmatmul.msk.bf16.gmra.mxu3 %vm484_vm0, %v2299_v2 }
  0xc0   : > { %v2324_v15 = vpop.f32.mrf.mxu2 }
  0xc1   : > { %v2242_v35 = vpop.eup %1727 }
  0xc2   : > { %v597_v32 = vpop.f32.mrf.mxu0 }
  0xc3   : > { %1729 = vtanh.f32 %v597_v32  ;;  %v766_v49 = vpop.f32.mrf.mxu1 }
  0xc8   : > { %v2332_v22 = vpop.f32.mrf.mxu2 }
  0xc9   : > { %v2244_v36 = vpop.eup %1729 }
  0xca   : > { %v600_v38 = vpop.f32.mrf.mxu0  ;;  %v1050_v39 = vpack.c.bf16 %v2244_v36, %v2242_v35 }
  0xcb   : > { %1731 = vtanh.f32 %v600_v38  ;;  %v769_v55 = vpop.f32.mrf.mxu1 }
  0xcd   : > { %1585 = vmatmul.msk.bf16.gmra.mxu0 %vm484_vm0, %v1655_v37  ;;  %1606 = vmatmul.msk.bf16.gmra.mxu2 %vm484_vm0, %v2339_v25 }
  0xce   : > { %1617 = vmatmul.msk.bf16.gmra.mxu1 %vm484_vm0, %v1655_v37 }
  0xcf   : > { %1637 = vmatmul.msk.bf16.gmra.mxu3 %vm484_vm0, %v2319_v13 }
  0xd0   : > { %v2344_v29 = vpop.f32.mrf.mxu2 }
  0xd1   : > { %v2257_v44 = vpop.eup %1731 }
  0xd2   : > { %v602_v41 = vpop.f32.mrf.mxu0 }
  0xd3   : > { %1733 = vtanh.f32 %v602_v41  ;;  %v771_v61 = vpop.f32.mrf.mxu1  ;;  %v2356_v41 = vpop.f32.mrf.mxu3 }
  0xd4   : > { %1735 = vtanh.f32 %v759_v34  ;;  %2776 = vst [vmem:[#allocation17_spill] sm:$0xff] %v2356_v41 }
  0xd5   : > { %1737 = vtanh.f32 %v761_v40 }
  0xd8   : > { %v707_v38 = vpop.f32.mrf.mxu2 }
  0xd9   : > { %v2259_v45 = vpop.eup %1733 }
  0xda   : > { %v605_v47 = vpop.f32.mrf.mxu0  ;;  %v1052_v48 = vpack.c.bf16 %v2259_v45, %v2257_v44  ;;  %v2264_v50 = vpop.eup %1735 }
  0xdb   : > { %2768 = vst [vmem:[#allocation9_spill] sm:$0xff] %v2264_v50  ;;  %v2266_v51 = vpop.eup %1737  ;;  %1739 = vtanh.f32 %v605_v47  ;;  %v774_v3 = vpop.f32.mrf.mxu1 }
  0xdc   : > { %2769 = vst [vmem:[#allocation10_spill] sm:$0xff] %v2266_v51  ;;  %v2362_v54 = vpop.f32.mrf.mxu3 }
  0xdd   : > { %1586 = vmatmul.msk.bf16.gmra.mxu0 %vm484_vm0, %v1656_v46  ;;  %2777 = vst [vmem:[#allocation18_spill] sm:$0xff] %v2362_v54 }
  0xde   : > { %1618 = vmatmul.msk.bf16.gmra.mxu1 %vm484_vm0, %v1656_v46 }
  0xdf   : > { %1638 = vmatmul.msk.bf16.gmra.mxu3 %vm484_vm0, %v2339_v25  ;;  %v1664_v25 = vld [vmem:[%s2178_s20 + $0x98] sm:$0xff] }
  0xe0   : > { %v2359_v46 = vpop.f32.mrf.mxu2 }
  0xe1   : > { %v2278_v56 = vpop.eup %1739 }
  0xe2   : > { %v607_v53 = vpop.f32.mrf.mxu0 }
  0xe3   : > { %1741 = vtanh.f32 %v607_v53  ;;  %v776_v7 = vpop.f32.mrf.mxu1  ;;  %v1661_v53 = vld [vmem:[%s2178_s20 + $0x80] sm:$0xff] }
  0xe4   : > { %1743 = vtanh.f32 %v764_v43 }
  0xe5   : > { %1745 = vtanh.f32 %v766_v49 }
  0xe6   : > { %1747 = vtanh.f32 %v769_v55 }
  0xe7   : > { %1749 = vtanh.f32 %v771_v61 }
  0xe8   : > { %1751 = vtanh.f32 %v774_v3 }
  0xe9   : > { %v2280_v57 = vpop.eup %1741  ;;  %1753 = vtanh.f32 %v776_v7 }
  0xea   : > { %v2283_v59 = vpop.f32.mrf.mxu0  ;;  %v1054_v60 = vpack.c.bf16 %v2280_v57, %v2278_v56  ;;  %v2287_v62 = vpop.eup %1743 }
  0xeb   : > { %2770 = vst [vmem:[#allocation11_spill] sm:$0xff] %v2287_v62  ;;  %v2289_v63 = vpop.eup %1745  ;;  %v779_v14 = vpop.f32.mrf.mxu1 }
  0xec   : > { %2771 = vst [vmem:[#allocation12_spill] sm:$0xff] %v2289_v63  ;;  %v2307_v8 = vpop.eup %1747  ;;  %1755 = vtanh.f32 %v779_v14 }
  0xed   : > { %1587 = vmatmul.msk.bf16.gmra.mxu0 %vm484_vm0, %v1657_v58  ;;  %2772 = vst [vmem:[#allocation13_spill] sm:$0xff] %v2307_v8  ;;  %v2309_v9 = vpop.eup %1749 }
  0xee   : > { %2773 = vst [vmem:[#allocation14_spill] sm:$0xff] %v2309_v9  ;;  %1619 = vmatmul.msk.bf16.gmra.mxu1 %vm484_vm0, %v1657_v58  ;;  %v2327_v19 = vpop.eup %1751 }
  0xef   : > { %2774 = vst [vmem:[#allocation15_spill] sm:$0xff] %v2327_v19  ;;  %v2329_v20 = vpop.eup %1753 }
  0xf0   : > { %2775 = vst [vmem:[#allocation16_spill] sm:$0xff] %v2329_v20 }
  0xf2   : > { %v2296_v1 = vpop.f32.mrf.mxu0  ;;  %v2347_v34 = vpop.eup %1755 }
  0xf3   : > { %v781_v18 = vpop.f32.mrf.mxu1 }
  0xf4   : > { %1757 = vtanh.f32 %v781_v18 }
  0xfa   : > { %v615_v6 = vpop.f32.mrf.mxu0  ;;  %v2349_v37 = vpop.eup %1757 }
  0xfb   : > { %v784_v26 = vpop.f32.mrf.mxu1 }
  0xfd   : > { %1588 = vmatmul.msk.bf16.gmra.mxu0 %vm484_vm0, %v1658_v5 }
  0xfe   : > { %1620 = vmatmul.msk.bf16.gmra.mxu1 %vm484_vm0, %v1658_v5 }
 0x102   : > { %v617_v12 = vpop.f32.mrf.mxu0 }
 0x103   : > { %v786_v33 = vpop.f32.mrf.mxu1 }
 0x10a   : > { %v620_v17 = vpop.f32.mrf.mxu0 }
 0x10b   : > { %v789_v43 = vpop.f32.mrf.mxu1 }
 0x10d   : > { %1589 = vmatmul.msk.bf16.gmra.mxu0 %vm484_vm0, %v1659_v16 }
 0x10e   : > { %1621 = vmatmul.msk.bf16.gmra.mxu1 %vm484_vm0, %v1659_v16 }
 0x112   : > { %v622_v24 = vpop.f32.mrf.mxu0 }
 0x113   : > { %v791_v5 = vpop.f32.mrf.mxu1 }
 0x11a   : > { %v625_v32 = vpop.f32.mrf.mxu0 }
 0x11b   : > { %1759 = vtanh.f32 %v625_v32 }
 0x11d   : > { %1590 = vmatmul.msk.bf16.gmra.mxu0 %vm484_vm0, %v1660_v30 }
 0x11e   : > { %1622 = vmatmul.msk.bf16.gmra.mxu1 %vm484_vm0, %v1660_v30 }
 0x121   : > { %v1760_v47 = vpop.eup %1759 }
 0x122   : > { %v627_v42 = vpop.f32.mrf.mxu0 }
 0x123   : > { %1761 = vtanh.f32 %v627_v42 }
 0x124   : > { %1763 = vtanh.f32 %v620_v17  ;;  %v2373_v17 = vpop.f32.mrf.mxu2 }
 0x125   : > { %1765 = vtanh.f32 %v622_v24  ;;  %v2377_v24 = vpop.f32.mrf.mxu3 }
 0x126   : > { %1767 = vtanh.f32 %v784_v26  ;;  %2778 = vst [vmem:[#allocation19_spill] sm:$0xff] %v2377_v24 }
 0x127   : > { %1769 = vtanh.f32 %v786_v33  ;;  %v794_v33 = vpop.f32.mrf.mxu1 }
 0x128   : > { %1771 = vtanh.f32 %v617_v12 }
 0x129   : > { %v1762_v49 = vpop.eup %1761  ;;  %1773 = vtanh.f32 %v615_v6 }
 0x12a   : > { %v1764_v55 = vpop.eup %1763  ;;  %v630_v58 = vpop.f32.mrf.mxu0  ;;  %v1062_v61 = vpack.c.bf16 %v1762_v49, %v1760_v47  ;;  %1775 = vtanh.f32 %v2296_v1 }
 0x12b   : > { %v1766_v3 = vpop.eup %1765  ;;  %1777 = vtanh.f32 %v2283_v59 }
 0x12c   : > { %v2364_v7 = vpop.eup %1767  ;;  %1122 = vmatpush.bf16.msrb.mxu2 %v1062_v61  ;;  %v1060_v16 = vpack.c.bf16 %v1766_v3, %v1764_v55  ;;  %1779 = vtanh.f32 %v630_v58  ;;  %v2380_v42 = vpop.f32.mrf.mxu2  ;;  %v1662_v55 = vld [vmem:[%s2178_s20 + $0x88] sm:$0xff] }
 0x12d   : > { %v2366_v14 = vpop.eup %1769  ;;  %1591 = vmatmul.msk.bf16.gmra.mxu0 %vm484_vm0, %v1661_v53  ;;  %v2387_v58 = vpop.f32.mrf.mxu3 }
 0x12e   : > { %v1772_v12 = vpop.eup %1771  ;;  %2779 = vst [vmem:[#allocation20_spill] sm:$0xff] %v2387_v58  ;;  %1623 = vmatmul.msk.bf16.gmra.mxu1 %vm484_vm0, %v1661_v53 }
 0x12f   : > { %v1774_v18 = vpop.eup %1773  ;;  %v796_v30 = vpop.f32.mrf.mxu1 }
 0x130   : > { %1123 = vmatpush.bf16.msrb.mxu2 %v1060_v16  ;;  %v1058_v26 = vpack.c.bf16 %v1772_v12, %v1774_v18  ;;  %v1776_v32 = vpop.eup %1775 }
 0x131   : > { %v1778_v59 = vpop.eup %1777 }
 0x132   : > { %v632_v1 = vpop.f32.mrf.mxu0  ;;  %v1056_v2 = vpack.c.bf16 %v1776_v32, %v1778_v59  ;;  %v2382_v47 = vpop.eup %1779 }
 0x133   : > { %1781 = vtanh.f32 %v632_v1 }
 0x134   : > { %1124 = vmatpush.bf16.msrb.mxu2 %v1058_v26  ;;  %1783 = vtanh.f32 %v789_v43 }
 0x135   : > { %1785 = vtanh.f32 %v791_v5 }
 0x136   : > { %1787 = vtanh.f32 %v2344_v29  ;;  %v2409_v29 = vpop.f32.mrf.mxu3 }
 0x137   : > { %1789 = vtanh.f32 %v707_v38  ;;  %2780 = vst [vmem:[#allocation21_spill] sm:$0xff] %v2409_v29  ;;  %v799_v13 = vpop.f32.mrf.mxu1 }
 0x138   : > { %1125 = vmatpush.bf16.msrb.mxu2 %v1056_v2  ;;  %1791 = vtanh.f32 %v2324_v15 }
 0x139   : > { %v2384_v49 = vpop.eup %1781  ;;  %1793 = vtanh.f32 %v2332_v22 }
 0x13a   : > { %v635_v61 = vpop.f32.mrf.mxu0  ;;  %v2392_v16 = vpop.eup %1783 }
 0x13b   : > { %v2397_v43 = vpop.eup %1785  ;;  %1795 = vtanh.f32 %v635_v61 }
 0x13c   : > { %1126 = vmatpush.bf16.msrb.mxu2 %v1054_v60  ;;  %v1788_v57 = vpop.eup %1787  ;;  %v717_v60 = vpop.f32.mrf.mxu2 }
 0x13d   : > { %1592 = vmatmul.msk.bf16.gmra.mxu0 %vm484_vm0, %v1662_v55  ;;  %v1790_v38 = vpop.eup %1789 }
 0x13e   : > { %v1792_v44 = vpop.eup %1791  ;;  %v1094_v45 = vpack.c.bf16 %v1790_v38, %v1788_v57  ;;  %v2425_v53 = vpop.f32.mrf.mxu3  ;;  %1624 = vmatmul.msk.bf16.gmra.mxu1 %vm484_vm0, %v1662_v55 }
 0x13f   : > { %2781 = vst [vmem:[#allocation22_spill] sm:$0xff] %v2425_v53  ;;  %v801_v1 = vpop.f32.mrf.mxu1 }
 0x140   : > { %1127 = vmatpush.bf16.msrb.mxu2 %v1052_v48  ;;  %v1794_v48 = vpop.eup %1793 }
 0x141   : > { %v2417_v15 = vpop.eup %1795  ;;  %v1092_v35 = vpack.c.bf16 %v1794_v48, %v1792_v44 }
 0x142   : > { %v637_v5 = vpop.f32.mrf.mxu0 }
 0x143   : > { %1797 = vtanh.f32 %v637_v5 }
 0x144   : > { %1799 = vtanh.f32 %v2301_v4  ;;  %1128 = vmatpush.bf16.msrb.mxu2 %v1050_v39  ;;  %v1663_v4 = vld [vmem:[%s2178_s20 + $0x90] sm:$0xff]  ;;  %v720_v18 = vpop.f32.mrf.mxu2  ;;  %s2007_s20 = scalar_lea.hbm %s2756_s4, 4 }
 0x145   : > { %1801 = vtanh.f32 %v2312_v10  ;;  %p2009_p4 = scmp.lt.s32.totalorder %s2007_s20, %s2003_s12 }
 0x146   : > { %1803 = vtanh.f32 %v794_v33 }
 0x147   : > { %1805 = vtanh.f32 %v796_v30  ;;  %v804_v59 = vpop.f32.mrf.mxu1  ;;  %p2010_p5 = por %p2009_p4, %p2008_p3 }
 0x148   : > { %1129 = vmatpush.bf16.msrb.mxu2 %v1048_v31  ;;  %v2438_v31 = vpop.f32.mrf.mxu3 }
 0x149   : > { %v2422_v22 = vpop.eup %1797  ;;  %2782 = vst [vmem:[#allocation23_spill] sm:$0xff] %v2438_v31  ;;  %p2011_p7 = pnand %p2010_p5, %p2006_p2 }
 0x14a   : > { %v1800_v36 = vpop.eup %1799  ;;  %v640_v39 = vpop.f32.mrf.mxu0 }
 0x14b   : > { %v1802_v12 = vpop.eup %1801  ;;  %1807 = vtanh.f32 %v640_v39 }
 0x14c   : > { %1148 = vmatpush.bf16.msra.mxu2 %v1094_v45  ;;  %v2429_v26 = vpop.eup %1803  ;;  %v1090_v27 = vpack.c.bf16 %v1802_v12, %v1800_v36  ;;  %v722_v2 = vpop.f32.mrf.mxu2 }
 0x14d   : > { %v2431_v32 = vpop.eup %1805  ;;  %1593 = vmatmul.msk.bf16.gmra.mxu0 %vm484_vm0, %v1663_v4 }
 0x14e   : > { %1625 = vmatmul.msk.bf16.gmra.mxu1 %vm484_vm0, %v1663_v4 }
 0x14f   : > { %v806_v55 = vpop.f32.mrf.mxu1 }
 0x150   : > { %1149 = vmatpush.bf16.msra.mxu2 %v1092_v35  ;;  %v2446_v57 = vpop.f32.mrf.mxu3 }
 0x151   : > { %v2441_v61 = vpop.eup %1807  ;;  %2783 = vst [vmem:[#allocation24_spill] sm:$0xff] %v2446_v57 }
 0x152   : > { %v642_v33 = vpop.f32.mrf.mxu0 }
 0x153   : > { %1809 = vtanh.f32 %v642_v33 }
 0x154   : > { %1150 = vmatpush.bf16.msra.mxu2 %v1090_v27  ;;  %1811 = vtanh.f32 %v799_v13  ;;  %v725_v13 = vpop.f32.mrf.mxu2 }
 0x155   : > { %1813 = vtanh.f32 %v801_v1 }
 0x156   : > { %1815 = vtanh.f32 %v2380_v42 }
 0x157   : > { %1817 = vtanh.f32 %v717_v60  ;;  %v809_v60 = vpop.f32.mrf.mxu1 }
 0x158   : > { %v2458_v35 = vpop.f32.mrf.mxu3 }
 0x159   : > { %v2443_v30 = vpop.eup %1809 }
 0x15a   : > { %v645_v38 = vpop.f32.mrf.mxu0  ;;  %v2450_v44 = vpop.eup %1811 }
 0x15b   : > { %v2452_v45 = vpop.eup %1813  ;;  %1819 = vtanh.f32 %v645_v38 }
 0x15c   : > { %v2461_v39 = vpop.eup %1815  ;;  %v727_v33 = vpop.f32.mrf.mxu2 }
 0x15d   : > { %1594 = vmatmul.msk.bf16.gmra.mxu0 %vm484_vm0, %v1664_v25  ;;  %v2463_v12 = vpop.eup %1817 }
 0x15e   : > { %1626 = vmatmul.msk.bf16.gmra.mxu1 %vm484_vm0, %v1664_v25 }
 0x15f   : > { %v811_v23 = vpop.f32.mrf.mxu1 }
 0x160   : > { %v2471_v38 = vpop.f32.mrf.mxu3 }
 0x161   : > { %v2465_v42 = vpop.eup %1819 }
 0x162   : > { %v647_v36 = vpop.f32.mrf.mxu0 }
 0x163   : > { %1821 = vtanh.f32 %v647_v36 }
 0x164   : > { %1823 = vtanh.f32 %v804_v59  ;;  %v2487_v40 = vpop.f32.mrf.mxu2 }
 0x165   : > { %1825 = vtanh.f32 %v806_v55 }
 0x166   : > { %1827 = vtanh.f32 %v720_v18 }
 0x167   : > { %1829 = vtanh.f32 %v722_v2  ;;  %v814_v48 = vpop.f32.mrf.mxu1 }
 0x168   : > { %v884_v0 = vpop.f32.mrf.mxu3  ;;  %1831 = vtanh.f32 %v809_v60 }
 0x169   : > { %v2469_v27 = vpop.eup %1821  ;;  %1833 = vtanh.f32 %v811_v23 }
 0x16a   : > { %v2473_v36 = vpop.f32.mrf.mxu0  ;;  %v2477_v52 = vpop.eup %1823  ;;  %1835 = vtanh.f32 %v725_v13 }
 0x16b   : > { %v2479_v59 = vpop.eup %1825  ;;  %1837 = vtanh.f32 %v727_v33 }
 0x16c   : > { %v2490_v6 = vpop.eup %1827  ;;  %v2500_v1 = vpop.f32.mrf.mxu2  ;;  %1839 = vtanh.f32 %v814_v48 }
 0x16d   : > { %1595 = vmatmul.msk.bf16.gmra.mxu0 %vm484_vm0, %v2210_v21  ;;  %v2492_v56 = vpop.eup %1829 }
 0x16e   : > { %v2496_v28 = vpop.eup %1831 }
 0x16f   : > { %v2498_v55 = vpop.eup %1833  ;;  %v816_v10 = vpop.f32.mrf.mxu1 }
 0x170   : > { %v886_v2 = vpop.f32.mrf.mxu3  ;;  %v2504_v60 = vpop.eup %1835  ;;  %1841 = vtanh.f32 %v816_v10 }
 0x171   : > { %v2506_v23 = vpop.eup %1837  ;;  %1843 = vtanh.f32 %v884_v0 }
 0x172   : > { %v2485_v11 = vpop.f32.mrf.mxu0  ;;  %v2512_v13 = vpop.eup %1839  ;;  %1845 = vtanh.f32 %v886_v2 }
 0x174   : > { %v2508_v5 = vpop.f32.mrf.mxu2 }
 0x176   : > { %v2514_v33 = vpop.eup %1841 }
 0x177   : > { %v2516_v41 = vpop.f32.mrf.mxu1  ;;  %v2524_v62 = vpop.eup %1843 }
 0x178   : > { %v889_v21 = vpop.f32.mrf.mxu3  ;;  %2784 = vst [vmem:[#allocation25_spill] sm:$0xff] %v2524_v62  ;;  %v2526_v63 = vpop.eup %1845 }
 0x17a   : > { %v655_v18 = vpop.f32.mrf.mxu0 }
 0x17c   : > { %v2520_v51 = vpop.f32.mrf.mxu2 }
 0x17f   : > { %v2522_v24 = vpop.f32.mrf.mxu1 }
 0x180   : > { %v891_v25 = vpop.f32.mrf.mxu3 }
 0x182   : > { %v657_v3 = vpop.f32.mrf.mxu0 }
 0x184   : > { %v740_v4 = vpop.f32.mrf.mxu2 }
 0x187   : > { %v2530_v8 = vpop.f32.mrf.mxu1 }
 0x188   : > { %v894_v10 = vpop.f32.mrf.mxu3 }
 0x18a   : > { %v660_v54 = vpop.f32.mrf.mxu0 }
 0x18c   : > { %v742_v0 = vpop.f32.mrf.mxu2 }
 0x190   : > { %v896_v50 = vpop.f32.mrf.mxu3 }
 0x192   : > { %v662_v48 = vpop.f32.mrf.mxu0 }
 0x19a   : > { %v665_v58 = vpop.f32.mrf.mxu0 }
 0x19b   : > { %1847 = vtanh.f32 %v665_v58 }
 0x1a1   : > { %v1848_v2 = vpop.eup %1847 }
 0x1a2   : > { %v667_v53 = vpop.f32.mrf.mxu0 }
 0x1a3   : > { %1849 = vtanh.f32 %v667_v53  ;;  %v2535_v53 = vpop.f32.mrf.mxu3 }
 0x1a4   : > { %1851 = vtanh.f32 %v662_v48 }
 0x1a5   : > { %1853 = vtanh.f32 %v889_v21  ;;  %v2537_v21 = vpop.f32.mrf.mxu1 }
 0x1a6   : > { %1855 = vtanh.f32 %v660_v54 }
 0x1a7   : > { %1857 = vtanh.f32 %v657_v3  ;;  %v745_v3 = vpop.f32.mrf.mxu2 }
 0x1a8   : > { %1859 = vtanh.f32 %v891_v25 }
 0x1a9   : > { %v1850_v9 = vpop.eup %1849  ;;  %1861 = vtanh.f32 %v655_v18 }
 0x1aa   : > { %v670_v57 = vpop.f32.mrf.mxu0  ;;  %v1078_v31 = vpack.c.bf16 %v1850_v9, %v1848_v2  ;;  %v1852_v19 = vpop.eup %1851  ;;  %1863 = vtanh.f32 %v2485_v11 }
 0x1ab   : > { %v2532_v58 = vpop.eup %1853  ;;  %1865 = vtanh.f32 %v2473_v36 }
 0x1ac   : > { %1135 = vmatpush.bf16.msrb.mxu3 %v1078_v31  ;;  %v1856_v29 = vpop.eup %1855  ;;  %1867 = vtanh.f32 %v670_v57 }
 0x1ad   : > { %v1858_v48 = vpop.eup %1857  ;;  %v1076_v20 = vpack.c.bf16 %v1852_v19, %v1856_v29  ;;  %v2544_v29 = vpop.f32.mrf.mxu3 }
 0x1ae   : > { %v2539_v54 = vpop.eup %1859  ;;  %v829_v36 = vpop.f32.mrf.mxu1 }
 0x1af   : > { %v1862_v9 = vpop.eup %1861  ;;  %v1101_v31 = vpack.c.bf16 %v2539_v54, %v2532_v58  ;;  %v747_v57 = vpop.f32.mrf.mxu2  ;;  %v2806_v58 = vld [vmem:[#allocation24_spill] sm:$0xff]  ;;  %v1985_v54 = vld [vmem:[%s2170_s10 + $0x8] sm:$0xff] }
 0x1b0   : > { %1136 = vmatpush.bf16.msrb.mxu3 %v1076_v20  ;;  %v1074_v25 = vpack.c.bf16 %v1858_v48, %v1862_v9  ;;  %v1864_v11 = vpop.eup %1863 }
 0x1b1   : > { %v1866_v2 = vpop.eup %1865 }
 0x1b2   : > { %v672_v18 = vpop.f32.mrf.mxu0  ;;  %v1072_v19 = vpack.c.bf16 %v1864_v11, %v1866_v2  ;;  %v2546_v62 = vpop.eup %1867  ;;  %v2786_v11 = vpack.c.bf16 %v2443_v30, %v2441_v61  ;;  %v2788_v30 = vpack.c.bf16 %v2384_v49, %v2382_v47 }
 0x1b3   : > { %1869 = vtanh.f32 %v672_v18  ;;  %v2785_v18 = vpack.c.bf16 %v2469_v27, %v2465_v42 }
 0x1b4   : > { %1137 = vmatpush.bf16.msrb.mxu3 %v1074_v25  ;;  %1871 = vtanh.f32 %v894_v10  ;;  %v1047_v10 = vld [vmem:[%s2754_s2] sm:$0xf] }
 0x1b5   : > { %1873 = vtanh.f32 %v896_v50  ;;  %1113 = vst [vmem:[#allocation1] ss:$9 sm:$0xff] %v1047_v10  ;;  %v2567_v2 = vpop.f32.mrf.mxu3 }
 0x1b6   : > { %1875 = vtanh.f32 %v745_v3 }
 0x1b7   : > { %1877 = vtanh.f32 %v747_v57 }
 0x1b8   : > { %1138 = vmatpush.bf16.msrb.mxu3 %v1072_v19  ;;  %1879 = vtanh.f32 %v740_v4  ;;  %v831_v19 = vpop.f32.mrf.mxu1 }
 0x1b9   : > { %v2548_v20 = vpop.eup %1869  ;;  %1881 = vtanh.f32 %v742_v0 }
 0x1ba   : > { %v2550_v48 = vpop.f32.mrf.mxu0  ;;  %v1080_v9 = vpack.c.bf16 %v2548_v20, %v2546_v62  ;;  %v2560_v25 = vpop.eup %1871  ;;  %1883 = vtanh.f32 %v2508_v5  ;;  %v2798_v62 = vpack.c.bf16 %v2366_v14, %v2364_v7  ;;  %v2805_v14 = vld [vmem:[#allocation23_spill] sm:$0xff] }
 0x1bb   : > { %v2562_v50 = vpop.eup %1873  ;;  %1885 = vtanh.f32 %v2520_v51 }
 0x1bc   : > { %1139 = vmatpush.bf16.msrb.mxu3 %v2785_v18  ;;  %v1876_v3 = vpop.eup %1875  ;;  %v1103_v57 = vpack.c.bf16 %v2562_v50, %v2560_v25  ;;  %v2787_v18 = vpack.c.bf16 %v2422_v22, %v2417_v15  ;;  %v2581_v10 = vld [vmem:[#allocation1 + $0x9] sm:$0xff]  ;;  %1887 = vtanh.f32 %v2487_v40 }
 0x1bd   : > { %v1878_v42 = vpop.eup %1877  ;;  %1889 = vtanh.f32 %v2500_v1  ;;  %v2587_v5 = vpop.f32.mrf.mxu3  ;;  %v2789_v1 = vpack.c.bf16 %v2506_v23, %v2504_v60  ;;  %v2791_v23 = vpack.c.bf16 %v2463_v12, %v2461_v39  ;;  %v2810_v50 = vld [vmem:[#allocation21_spill] sm:$0xff] }
 0x1be   : > { %v1880_v4 = vpop.eup %1879  ;;  %v1110_v0 = vpack.c.bf16 %v1878_v42, %v1876_v3  ;;  %1891 = vtanh.f32 %v2359_v46 }
 0x1bf   : > { %v1882_v61 = vpop.eup %1881 }
 0x1c0   : > { %1140 = vmatpush.bf16.msrb.mxu3 %v2786_v11  ;;  %v1108_v11 = vpack.c.bf16 %v1882_v61, %v1880_v4  ;;  %v1884_v22 = vpop.eup %1883  ;;  %v834_v3 = vpop.f32.mrf.mxu1 }
 0x1c1   : > { %v1886_v51 = vpop.eup %1885  ;;  %1893 = vtanh.f32 %v834_v3 }
 0x1c2   : > { %v2569_v27 = vpop.f32.mrf.mxu0  ;;  %v1888_v47 = vpop.eup %1887  ;;  %v1106_v49 = vpack.c.bf16 %v1886_v51, %v1884_v22  ;;  %v2598_v51 = vld [vmem:[#allocation1] sm:$0xff] }
 0x1c3   : > { %v1890_v42 = vpop.eup %1889  ;;  %1130 = vmatmul.bf16.vlgmr.msrb.gmra.mxu2 %v2598_v51 }
 0x1c4   : > { %1141 = vmatpush.bf16.msrb.mxu3 %v2787_v18  ;;  %v1104_v40 = vpack.c.bf16 %v1890_v42, %v1888_v47 }
 0x1c5   : > { %v909_v4 = vpop.f32.mrf.mxu3 }
 0x1c8   : > { %1142 = vmatpush.bf16.msrb.mxu3 %v2788_v30  ;;  %v1892_v30 = vpop.eup %1891 }
 0x1c9   : > { %v1894_v22 = vpop.eup %1893 }
 0x1ca   : > { %v2585_v15 = vpop.f32.mrf.mxu0 }
 0x1cb   : > { %1143 = vmatmul.bf16.vlgmr.msrb.gmra.mxu3 %v2581_v10 }
 0x1cc   : > { %1161 = vmatpush.bf16.msra.mxu3 %v1110_v0  ;;  %v836_v0 = vpop.f32.mrf.mxu1 }
 0x1cd   : > { %1895 = vtanh.f32 %v836_v0  ;;  %v911_v46 = vpop.f32.mrf.mxu3 }
 0x1ce   : > { %1897 = vtanh.f32 %v2373_v17 }
 0x1cf   : > { %1899 = vtanh.f32 %v829_v36 }
 0x1d0   : > { %1162 = vmatpush.bf16.msra.mxu3 %v1108_v11  ;;  %v2790_v11 = vpack.c.bf16 %v2492_v56, %v2490_v6  ;;  %1901 = vtanh.f32 %v831_v19 }
 0x1d1   : > { %1903 = vtanh.f32 %v2530_v8 }
 0x1d2   : > { %v682_v18 = vpop.f32.mrf.mxu0  ;;  %1905 = vtanh.f32 %v2537_v21 }
 0x1d3   : > { %v1896_v47 = vpop.eup %1895  ;;  %1907 = vtanh.f32 %v2516_v41 }
 0x1d4   : > { %1163 = vmatpush.bf16.msra.mxu3 %v1106_v49  ;;  %v1898_v60 = vpop.eup %1897  ;;  %v1079_v3 = vpack.c.bf16 %v1896_v47, %v1894_v22  ;;  %v2606_v49 = vld [vmem:[#allocation1 + $0x1b] sm:$0xff]  ;;  %v2609_v19 = vpop.f32.mrf.mxu1  ;;  %1909 = vtanh.f32 %v2522_v24  ;;  %v2792_v22 = vpack.c.bf16 %v2514_v33, %v2512_v13 }
 0x1d5   : > { %v1096_v6 = vpack.c.bf16 %v1898_v60, %v1892_v30  ;;  %v1900_v56 = vpop.eup %1899  ;;  %v914_v42 = vpop.f32.mrf.mxu3 }
 0x1d6   : > { %v1902_v36 = vpop.eup %1901 }
 0x1d7   : > { %v1904_v39 = vpop.eup %1903  ;;  %v1077_v12 = vpack.c.bf16 %v1902_v36, %v1900_v56 }
 0x1d8   : > { %1164 = vmatpush.bf16.msra.mxu3 %v1104_v40  ;;  %v1906_v8 = vpop.eup %1905 }
 0x1d9   : > { %v1908_v40 = vpop.eup %1907  ;;  %v1075_v0 = vpack.c.bf16 %v1906_v8, %v1904_v39 }
 0x1da   : > { %v685_v61 = vpop.f32.mrf.mxu0 }
 0x1dc   : > { %1165 = vmatpush.bf16.msra.mxu3 %v2789_v1  ;;  %v1910_v1 = vpop.eup %1909 }
 0x1dd   : > { %v1073_v30 = vpack.c.bf16 %v1910_v1, %v1908_v40  ;;  %v916_v24 = vpop.f32.mrf.mxu3  ;;  %v2812_v1 = vld [vmem:[#allocation12_spill] sm:$0xff] }
 0x1e0   : > { %1166 = vmatpush.bf16.msra.mxu3 %v2790_v11  ;;  %v2613_v11 = vpop.f32.mrf.mxu1 }
 0x1e2   : > { %v687_v17 = vpop.f32.mrf.mxu0 }
 0x1e4   : > { %1167 = vmatpush.bf16.msra.mxu3 %v2791_v23 }
 0x1e8   : > { %1168 = vmatpush.bf16.msra.mxu3 %v1096_v6  ;;  %v2621_v56 = vpop.f32.mrf.mxu1 }
 0x1ea   : > { %v690_v21 = vpop.f32.mrf.mxu0 }
 0x1eb   : > { %1169 = vmatmul.bf16.vlgmr.msra.gmra.mxu3 %v2606_v49  ;;  %1911 = vtanh.f32 %v690_v21  ;;  %v2797_v21 = vpack.c.bf16 %v2397_v43, %v2392_v16  ;;  %v2799_v43 = vpack.c.bf16 %v2349_v37, %v2347_v34  ;;  %v2808_v34 = vld [vmem:[#allocation13_spill] sm:$0xff] }
 0x1ec   : > { %1187 = vmatpush.bf16.msrb.mxu3 %v1079_v3  ;;  %v2793_v3 = vpack.c.bf16 %v2498_v55, %v2496_v28 }
 0x1f0   : > { %1188 = vmatpush.bf16.msrb.mxu3 %v1077_v12 }
 0x1f1   : > { %v1912_v47 = vpop.eup %1911 }
 0x1f2   : > { %v692_v41 = vpop.f32.mrf.mxu0 }
 0x1f3   : > { %1913 = vtanh.f32 %v692_v41 }
 0x1f4   : > { %1189 = vmatpush.bf16.msrb.mxu3 %v1075_v0  ;;  %1915 = vtanh.f32 %v914_v42 }
 0x1f5   : > { %1917 = vtanh.f32 %v687_v17 }
 0x1f6   : > { %1919 = vtanh.f32 %v916_v24  ;;  %v2815_v24 = vld [vmem:[#allocation19_spill] sm:$0xff] }
 0x1f7   : > { %1921 = vtanh.f32 %v685_v61 }
 0x1f8   : > { %1190 = vmatpush.bf16.msrb.mxu3 %v1073_v30  ;;  %1923 = vtanh.f32 %v909_v4  ;;  %v2813_v30 = vld [vmem:[#allocation11_spill] sm:$0xff] }
 0x1f9   : > { %v1914_v60 = vpop.eup %1913  ;;  %1925 = vtanh.f32 %v682_v18  ;;  %v2794_v18 = vpack.c.bf16 %v2479_v59, %v2477_v52  ;;  %v2814_v41 = vpack.c.bf16 %v2812_v1, %v2813_v30 }
 0x1fa   : > { %v1916_v23 = vpop.eup %1915  ;;  %1927 = vtanh.f32 %v911_v46  ;;  %v1088_v6 = vpack.c.bf16 %v1914_v60, %v1912_v47 }
 0x1fb   : > { %v1918_v17 = vpop.eup %1917  ;;  %1929 = vtanh.f32 %v2585_v15 }
 0x1fc   : > { %1191 = vmatpush.bf16.msrb.mxu3 %v2792_v22  ;;  %v1920_v13 = vpop.eup %1919  ;;  %1151 = vmatpush.bf16.msra.mxu2 %v1088_v6  ;;  %1931 = vtanh.f32 %v2569_v27  ;;  %v2795_v27 = vpack.c.bf16 %v2452_v45, %v2450_v44  ;;  %v2816_v22 = vld [vmem:[#allocation20_spill] sm:$0xff]  ;;  %v2818_v6 = vld [vmem:[#allocation9_spill] sm:$0xff] }
 0x1fd   : > { %v1922_v33 = vpop.eup %1921  ;;  %1933 = vtanh.f32 %v2567_v2  ;;  %v1111_v61 = vpack.c.bf16 %v1920_v13, %v1916_v23  ;;  %v2821_v13 = vld [vmem:[#allocation18_spill] sm:$0xff] }
 0x1fe   : > { %v1924_v4 = vpop.eup %1923  ;;  %v1086_v28 = vpack.c.bf16 %v1918_v17, %v1922_v33  ;;  %1935 = vtanh.f32 %v2550_v48  ;;  %v2636_v48 = vpop.f32.mrf.mxu1 }
 0x1ff   : > { %v1926_v55 = vpop.eup %1925  ;;  %1937 = vtanh.f32 %v2587_v5 }
 0x200   : > { %1192 = vmatpush.bf16.msrb.mxu3 %v2793_v3  ;;  %v1928_v46 = vpop.eup %1927  ;;  %1152 = vmatpush.bf16.msra.mxu2 %v1086_v28  ;;  %1939 = vtanh.f32 %v2535_v53  ;;  %v2642_v53 = vld [vmem:[#allocation1 + $0x12] sm:$0xff] }
 0x201   : > { %v1930_v15 = vpop.eup %1929  ;;  %v1109_v52 = vpack.c.bf16 %v1928_v46, %v1924_v4  ;;  %1941 = vtanh.f32 %v2544_v29  ;;  %v2796_v29 = vpack.c.bf16 %v2431_v32, %v2429_v26  ;;  %v2817_v3 = vld [vmem:[#allocation10_spill] sm:$0xff] }
 0x202   : > { %v1084_v36 = vpack.c.bf16 %v1926_v55, %v1930_v15  ;;  %v1932_v2 = vpop.eup %1931  ;;  %1943 = vtanh.f32 %v2458_v35  ;;  %v2800_v35 = vld [vmem:[#allocation25_spill] sm:$0xff]  ;;  %v2819_v17 = vpack.c.bf16 %v2817_v3, %v2818_v6 }
 0x203   : > { %v1934_v59 = vpop.eup %1933  ;;  %1945 = vtanh.f32 %v2471_v38  ;;  %v2801_v20 = vpack.c.bf16 %v2526_v63, %v2800_v35  ;;  %v2802_v38 = vld [vmem:[#allocation16_spill] sm:$0xff] }
 0x204   : > { %1193 = vmatpush.bf16.msrb.mxu3 %v2794_v18  ;;  %1153 = vmatpush.bf16.msra.mxu2 %v1084_v36  ;;  %v1936_v39 = vpop.eup %1935  ;;  %1947 = vtanh.f32 %v2805_v14 }
 0x205   : > { %v1938_v5 = vpop.eup %1937  ;;  %v1082_v12 = vpack.c.bf16 %v1932_v2, %v1936_v39  ;;  %1949 = vtanh.f32 %v2806_v58 }
 0x206   : > { %v1940_v44 = vpop.eup %1939  ;;  %v1107_v45 = vpack.c.bf16 %v1938_v5, %v1934_v59  ;;  %1951 = vtanh.f32 %v2810_v50 }
 0x207   : > { %v1942_v8 = vpop.eup %1941 }
 0x208   : > { %1194 = vmatpush.bf16.msrb.mxu3 %v2795_v27  ;;  %1154 = vmatpush.bf16.msra.mxu2 %v1082_v12  ;;  %v1105_v42 = vpack.c.bf16 %v1942_v8, %v1940_v44  ;;  %v1944_v16 = vpop.eup %1943 }
 0x209   : > { %v1946_v32 = vpop.eup %1945 }
 0x20a   : > { %v1097_v7 = vpack.c.bf16 %v1946_v32, %v1944_v16  ;;  %v1948_v40 = vpop.eup %1947 }
 0x20b   : > { %1195 = vmatmul.bf16.vlgmr.msrb.gmra.mxu3 %v2581_v10  ;;  %v849_v10 = vpop.f32.mrf.mxu1  ;;  %v1950_v0 = vpop.eup %1949 }
 0x20c   : > { %1213 = vmatpush.bf16.msra.mxu3 %v1111_v61  ;;  %1155 = vmatpush.bf16.msra.mxu2 %v1080_v9  ;;  %v2803_v9 = vld [vmem:[#allocation15_spill] sm:$0xff]  ;;  %v1952_v47 = vpop.eup %1951  ;;  %v1095_v60 = vpack.c.bf16 %v1950_v0, %v1948_v40 }
 0x20d   : > { %v2804_v25 = vpack.c.bf16 %v2802_v38, %v2803_v9 }
 0x20f   : > { %1156 = vmatmul.bf16.vlgmr.msra.gmra.mxu2 %v2642_v53 }
 0x210   : > { %1214 = vmatpush.bf16.msra.mxu3 %v1109_v52  ;;  %1174 = vmatpush.bf16.msrb.mxu2 %v2796_v29 }
 0x213   : > { %v851_v26 = vpop.f32.mrf.mxu1 }
 0x214   : > { %1215 = vmatpush.bf16.msra.mxu3 %v1107_v45  ;;  %1175 = vmatpush.bf16.msrb.mxu2 %v2797_v21 }
 0x218   : > { %1216 = vmatpush.bf16.msra.mxu3 %v1105_v42  ;;  %1176 = vmatpush.bf16.msrb.mxu2 %v2798_v62 }
 0x21b   : > { %v854_v63 = vpop.f32.mrf.mxu1 }
 0x21c   : > { %1217 = vmatpush.bf16.msra.mxu3 %v1103_v57  ;;  %1177 = vmatpush.bf16.msrb.mxu2 %v2799_v43  ;;  %v2811_v57 = vld [vmem:[#allocation22_spill] sm:$0xff] }
 0x21d   : > { %1953 = vtanh.f32 %v2811_v57 }
 0x21e   : > { %1955 = vtanh.f32 %v2815_v24 }
 0x21f   : > { %1957 = vtanh.f32 %v2816_v22 }
 0x220   : > { %1218 = vmatpush.bf16.msra.mxu3 %v1101_v31  ;;  %1178 = vmatpush.bf16.msrb.mxu2 %v2804_v25  ;;  %v2807_v31 = vld [vmem:[#allocation14_spill] sm:$0xff] }
 0x221   : > { %v2809_v37 = vpack.c.bf16 %v2807_v31, %v2808_v34 }
 0x223   : > { %v1954_v23 = vpop.eup %1953  ;;  %v856_v18 = vpop.f32.mrf.mxu1 }
 0x224   : > { %1219 = vmatpush.bf16.msra.mxu3 %v2801_v20  ;;  %1179 = vmatpush.bf16.msrb.mxu2 %v2809_v37  ;;  %v1956_v33 = vpop.eup %1955  ;;  %v1093_v4 = vpack.c.bf16 %v1954_v23, %v1952_v47 }
 0x225   : > { %v1958_v28 = vpop.eup %1957 }
 0x226   : > { %v1091_v61 = vpack.c.bf16 %v1958_v28, %v1956_v33 }
 0x228   : > { %1220 = vmatpush.bf16.msra.mxu3 %v1097_v7  ;;  %1180 = vmatpush.bf16.msrb.mxu2 %v2814_v41 }
 0x22b   : > { %1221 = vmatmul.bf16.vlgmr.msra.gmra.mxu3 %v2606_v49  ;;  %v2820_v49 = vld [vmem:[#allocation17_spill] sm:$0xff] }
 0x22c   : > { %1291 = vmatpush.xpose.msrb.mxu3 %v1985_v54  ;;  %1181 = vmatpush.bf16.msrb.mxu2 %v2819_v17  ;;  %1959 = vtanh.f32 %v2820_v49 }
 0x22d   : > { %1961 = vtanh.f32 %v2821_v13 }
 0x22e   : > { %1963 = vtanh.f32 %v854_v63 }
 0x22f   : > { %1182 = vmatmul.bf16.vlgmr.msrb.gmra.mxu2 %v2598_v51  ;;  %1965 = vtanh.f32 %v856_v18 }
 0x230   : > { %1200 = vmatpush.bf16.msra.mxu2 %v1095_v60  ;;  %1967 = vtanh.f32 %v849_v10  ;;  %v1251_v60 = vlaneseq }
 0x231   : > { %1969 = vtanh.f32 %v851_v26 }
 0x232   : > { %v1960_v55 = vpop.eup %1959  ;;  %1971 = vtanh.f32 %v2621_v56  ;;  %vm1253_vm2 = vcmp.lt.s32.totalorder %v1251_v60, 256 }
 0x233   : > { %v1962_v46 = vpop.eup %1961  ;;  %1973 = vtanh.f32 %v2636_v48  ;;  %v1986_v48 = vld [vmem:[%s2170_s10] sm:$0xff]  ;;  %s1303_s10 = scalar_lea.sflag [#allocation6], %s2166_s8 }
 0x234   : > { %1201 = vmatpush.bf16.msra.mxu2 %v1093_v4  ;;  %v1964_v15 = vpop.eup %1963  ;;  %v1089_v27 = vpack.c.bf16 %v1962_v46, %v1960_v55  ;;  %1975 = vtanh.f32 %v2609_v19 }
 0x235   : > { %v1966_v36 = vpop.eup %1965  ;;  %1977 = vtanh.f32 %v2613_v11 }
 0x236   : > { %v1968_v2 = vpop.eup %1967  ;;  %v1087_v51 = vpack.c.bf16 %v1966_v36, %v1964_v15 }
 0x237   : > { %v1970_v52 = vpop.eup %1969 }
 0x238   : > { %1202 = vmatpush.bf16.msra.mxu2 %v1091_v61  ;;  %v1972_v59 = vpop.eup %1971  ;;  %v1085_v39 = vpack.c.bf16 %v1970_v52, %v1968_v2 }
 0x239   : > { %v1974_v5 = vpop.eup %1973 }
 0x23a   : > { %v1976_v12 = vpop.eup %1975  ;;  %v1083_v44 = vpack.c.bf16 %v1974_v5, %v1972_v59 }
 0x23b   : > { %v1978_v45 = vpop.eup %1977 }
 0x23c   : > { %1203 = vmatpush.bf16.msra.mxu2 %v1089_v27  ;;  %v1081_v56 = vpack.c.bf16 %v1978_v45, %v1976_v12 }
 0x240   : > { %1204 = vmatpush.bf16.msra.mxu2 %v1087_v51 }
 0x244   : > { %1205 = vmatpush.bf16.msra.mxu2 %v1085_v39 }
 0x246   : > { %v1131_v19 = vpop.f32.mrf.mxu2 }
 0x248   : > { %1206 = vmatpush.bf16.msra.mxu2 %v1083_v44 }
 0x24c   : > { %1207 = vmatpush.bf16.msra.mxu2 %v1081_v56 }
 0x24e   : > { %v1144_v8 = vpop.f32.mrf.mxu3  ;;  %v1133_v10 = vpop.f32.mrf.mxu2 }
 0x24f   : > { %1208 = vmatmul.bf16.vlgmr.msra.gmra.mxu2 %v2642_v53  ;;  %v1145_v42 = vadd.f32 %v1144_v8, %v1131_v19 }
 0x250   : > { %1271 = vmatpush.xpose.msrb.mxu2 %v1986_v48 }
 0x256   : > { %v1146_v29 = vpop.f32.mrf.mxu3 }
 0x26e   : > { %v1170_v11 = vpop.f32.mrf.mxu3 }
 0x276   : > { %v1172_v21 = vpop.f32.mrf.mxu3 }
 0x28e   : > { %v1196_v62 = vpop.f32.mrf.mxu3 }
 0x292   : > { %v1157_v26 = vpop.f32.mrf.mxu2 }
 0x293   : > { %v1158_v16 = vadd.f32 %v1157_v26, %v1145_v42 }
 0x295   : > { %v1171_v43 = vadd.f32 %v1170_v11, %v1158_v16 }
 0x296   : > { %v1198_v32 = vpop.f32.mrf.mxu3 }
 0x297   : > { %v1227_v54 = vsel %vm1226_vm1, %v1171_v43, -inf }
 0x29a   : > { %v1159_v35 = vpop.f32.mrf.mxu2 }
 0x2ae   : > { %v1222_v20 = vpop.f32.mrf.mxu3 }
 0x2b2   : > { %v1183_v9 = vpop.f32.mrf.mxu2 }
 0x2b3   : > { %v1197_v7 = vadd.f32 %v1196_v62, %v1183_v9 }
 0x2b6   : > { %v1224_v38 = vpop.f32.mrf.mxu3 }
 0x2ba   : > { %v1185_v25 = vpop.f32.mrf.mxu2 }
 0x2d2   : > { %v1209_v14 = vpop.f32.mrf.mxu2 }
 0x2d3   : > { %v1210_v53 = vadd.f32 %v1209_v14, %v1197_v7 }
 0x2d5   : > { %v1223_v58 = vadd.f32 %v1222_v20, %v1210_v53 }
 0x2d7   : > { %v1228_v31 = vsel %vm1226_vm1, %v1223_v58, -inf }
 0x2d8   : > { %v1229_v34 = vmax.f32 %v1227_v54, %v1228_v31 }
 0x2da   : > { %1230 = vmax.xlane.f32.xlu0 %v1229_v34  ;;  %v1211_v37 = vpop.f32.mrf.mxu2 }
 0x34d   : > { %v1231_v50 = vpop.xlane.xlu0 %1230 }
 0x34e   : > { %v1232_v63 = vsub.f32 %v1171_v43, %v1231_v50  ;;  %v1233_v57 = vsub.f32 %v1223_v58, %v1231_v50 }
 0x350   : > { %v1234_v40 = vmul.f32 1.442695, %v1232_v63  ;;  %v1236_v0 = vmul.f32 1.442695, %v1233_v57 }
 0x352   : > { %1979 = vpow2.f32 %v1234_v40 }
 0x353   : > { %1981 = vpow2.f32 %v1236_v0 }
 0x358   : > { %v1980_v1 = vpop.eup %1979 }
 0x359   : > { %v1982_v30 = vpop.eup %1981  ;;  %v1238_v41 = vsel %vm1226_vm1, %v1980_v1, 0.0 }
 0x35a   : > { %v1239_v24 = vsel %vm1226_vm1, %v1982_v30, 0.0 }
 0x35b   : > { %v1240_v22 = vadd.f32 %v1239_v24, %v1238_v41 }
 0x35d   : > { %1241 = vadd.xlane.f32.xlu0 %v1240_v22 }
 0x3d0   : > { %v1242_v47 = vpop.xlane.xlu0 %1241 }
 0x3d1   : > { %1983 = vrcp.f32 %v1242_v47 }
 0x3d7   : > { %v1984_v23 = vpop.eup %1983 }
 0x3d8   : > { %v1244_v3 = vmul.f32 %v1984_v23, %v1980_v1  ;;  %v1245_v6 = vmul.f32 %v1984_v23, %v1982_v30 }
 0x3da   : > { %v1248_v17 = vrot.slane %v1245_v6, 7  ;;  %1272 = vmatmul.f32.vlgmr.msrb.gmra.mxu2 %v1244_v3  ;;  %1292 = vmatmul.f32.vlgmr.msrb.gmra.mxu3 %v1245_v6 }
 0x3dc   : > { %v1249_v49 = vsel %vm1226_vm1, %v1244_v3, %v1248_v17 }
 0x3dd   : > { %1255 = vst.msk [vmem:[%s246_s28] sm:$0x3] %vm1253_vm2, %v1249_v49 }
 0x3de   : > { %2014 = shalt.err (!%p2011_p7)
}
 0x3df   : > { %1680 = dma.vmem_to_hbm [thread:$0]  (%p2147_p6), %s1329_s7, 32, %s1331_s9, %s1303_s10   ;;  %vm1296_vm3 = vcmask 24576  }
 0x3e0   : > { %s1312_s29 = scalar_lea.hbm %s2755_s3, %s2129_s19  ;;  %s239_s30 = scalar_lea.vmem [#allocation3], %s2166_s8 }
 0x3e1   : > { %s1314_s5 = sshll.u32 %s239_s30, 4  ;;  %s1316_s6 = sshll.u32 %s1312_s29, 4  ;;  %s1315_s5 = int_to_ptr.vmem [resolvable:$true] %s1314_s5  ;;  %s1317_s6 = int_to_ptr.hbm [resolvable:$true] %s1316_s6 }
 0x3e2   : > { %s1299_s11 = scalar_lea.sflag [#allocation4], %s2166_s8  ;;  %s2029_s12 = sshra.s32 %s1317_s6, 4  ;;  %s2030_s12 = int_to_ptr.hbm [resolvable:$true] %s2029_s12 }
 0x3e3   : > { %s2031_s13 = scalar_lea.hbm %s2030_s12, 1  ;;  %s2035_s9 = scalar_lea.hbm %s2755_s3, 2 }
 0x3e4   : > { %p2032_p10 = scmp.ne.s32.totalorder %s2030_s12, %s2031_s13  ;;  %p2036_p13 = scmp.lt.s32.totalorder %s2030_s12, %s2755_s3 }
 0x3e5   : > { %p2037_p0 = scmp.lt.s32.totalorder %s2035_s9, %s2031_s13 }
 0x3e6   : > { %p2033_p11 = pnand %p2032_p10, %p2147_p6 }
 0x3e7   : > { %p2038_p1 = por %p2037_p0, %p2036_p13 }
 0x3e8   : > { %p2034_p12 = pneg %p2033_p11 }
 0x3ea   : > { %p2039_p2 = pnand %p2038_p1, %p2034_p12 }
 0x45d   : > { %v1273_v13 = vpop.f32.mrf.mxu2  ;;  %v1293_v33 = vpop.f32.mrf.mxu3 }
 0x45e   : > { %v1294_v4 = vadd.f32 %v1293_v33, %v1273_v13 }
 0x460   : > { %1297 = vst.msk [vmem:[%s239_s30] sm:$0x1] %vm1296_vm3, %v1294_v4 }
 0x461   : > { %2042 = shalt.err (!%p2039_p2)
}
 0x462   : > { %1679 = dma.vmem_to_hbm [thread:$0]  (%p2147_p6), %s1315_s5, 16, %s1317_s6, %s1299_s11  }
 0x463 PF: > { %s1342_s8 = sand.u32 1, %s2069_s15   ;;  %p1684_p3 = pnand %p1438_p9, %p2151_p8 }
 0x464   : > { %s1343_s20 = scalar_lea.sflag [#allocation4], %s1342_s8 }
 0x465   : > { %p1685_p4 = pneg %p1684_p3 }
 0x467   : > { %2060 = dma.done.wait (%p1685_p4), %s1343_s20, 16  }
 0x468   : > { %2062 = vsyncadd (%p1685_p4), %s1343_s20, 4294967280  ;;  %s1352_s22 = scalar_lea.sflag [#allocation6], %s1342_s8 }
 0x469   : > { %2064 = dma.done.wait (%p1685_p4), %s1352_s22, 32  }
 0x46a   : > { %2066 = vsyncadd (%p1685_p4), %s1352_s22, 4294967264  ;;  %p18_p6 = scmp.ge.s32.totalorder %s2133_s21, 4   ;;  %s2822_s15 = smov %s2073_s16 }
 0x46b   : > { %s2823_s16 = smov %s2077_s17  ;;  %s2824_s17 = smov %s2145_s24 }
 0x46c   : > { %s2825_s18 = smov %s2133_s21  ;;  %20 = sbr.rel (!%p18_p6) target bundleno = 5 (0x5), region = 115 }
 0x471   :  { %1358 = vsyncpa [#allocation4], 1 }
 0x472   :  { %1360 = vsyncpa [#allocation4 + $0x1], 1 }
 0x473   :  { %1361 = vsyncpa [#allocation6], 1 }
 0x474   :  { %1363 = vsyncpa [#allocation6 + $0x1], 1 }

</bundles_post_ra>
